<compile_context>
chip_gen: v7x
topology: tpu7x:2x2x1
jax: 0.10.0
libtpu: 0.0.40
codegen_flags: <defaults>
</compile_context>

<pallas_src>
import functools

import jax
import jax.numpy as jnp
from jax.experimental import pallas as pl
from jax.experimental.pallas import tpu as pltpu

BN_EPS = 1e-5


def _fold_width(v, W, C):
    """v: (R, W*C) f32 per-lane partial sums.  Returns (R, W*C) where every lane
    holds the total over the W width positions of its channel, i.e. the per-channel
    sum already broadcast back into the lane-dense layout.  Rolling the full lane
    axis by k*C is exactly a cyclic shift by k width positions (channel preserved),
    so a log2(W)-step doubling reduction works when W is a power of two."""
    acc = v
    if W & (W - 1) == 0:                       # power-of-two width: log-depth fold
        step = 1
        while step < W:
            acc = acc + pltpu.roll(acc, step * C, axis=1)
            step *= 2
    else:                                      # generic fallback: linear fold
        for k in range(1, W):
            acc = acc + pltpu.roll(v, k * C, axis=1)
    return acc


def _conv3x3_bn(x2d, w_ref, g_ref, b_ref, mask_up, mask_dn, W, C, inv_n):
    """x2d: (B*H, W*C) f32 lane-dense activations.
    w_ref: (3*W*Cin, W*Cout) bf16 width-folded banded conv weight.
    mask_up / mask_dn: (B*H, 1) f32 row masks implementing the zero padding in H.
    Returns BN(conv3x3(x2d)) as (B*H, W*Cout) f32 (training-mode biased stats)."""
    BH = x2d.shape[0]
    # Three kernel-row taps via sublane rolls + H-boundary masks (zero padding in H).
    # The roll wraps across image boundaries inside the batch dim, but the masks
    # zero exactly those wrapped rows.
    up = pltpu.roll(x2d, 1, axis=0) * mask_up           # row i-1
    mid = x2d                                           # row i
    down = pltpu.roll(x2d, BH - 1, axis=0) * mask_dn    # row i+1

    # One deep-K matmul per conv: K = 3*W*C, N = W*Cout (bf16 feeds, f32 accumulate).
    cols = jnp.concatenate([up, mid, down], axis=1).astype(jnp.bfloat16)
    y = jnp.dot(cols, w_ref[...], preferred_element_type=jnp.float32)

    # Single-pass BatchNorm statistics in f32: one fused row reduction for
    # [sum, sum_of_squares], then a lane-roll fold across W.  var = E[x^2]-E[x]^2.
    WC = y.shape[1]
    s12 = jnp.sum(jnp.concatenate([y, y * y], axis=1), axis=0, keepdims=True)
    s1 = _fold_width(s12[:, :WC], W, C)
    s2 = _fold_width(s12[:, WC:], W, C)
    mean = s1 * inv_n
    var = s2 * inv_n - mean * mean
    scale = jax.lax.rsqrt(var + BN_EPS) * g_ref[...]
    return y * scale + (b_ref[...] - mean * scale)


def _block_kernel(H, W, C, x_ref, w1_ref, g1_ref, b1_ref, w2_ref, g2_ref, b2_ref,
                  out_ref):
    BH, _ = x_ref.shape
    inv_n = 1.0 / float(BH * W)               # BN count per channel = B*H*W
    x = x_ref[...]                            # (B*H, W*C) f32; also the identity

    # (B*H, 1) f32 masks for the H zero-padding of the row-shifted taps.
    row_in_img = jax.lax.broadcasted_iota(jnp.int32, (BH, 1), 0) % H
    mask_up = (row_in_img >= 1).astype(jnp.float32)         # valid when i-1 exists
    mask_dn = (row_in_img <= H - 2).astype(jnp.float32)     # valid when i+1 exists

    h = _conv3x3_bn(x, w1_ref, g1_ref, b1_ref, mask_up, mask_dn, W, C, inv_n)
    h = jnp.maximum(h, 0.0)                                        # ReLU
    h = _conv3x3_bn(h, w2_ref, g2_ref, b2_ref, mask_up, mask_dn, W, C, inv_n)
    out_ref[...] = jnp.maximum(h + x, 0.0).astype(out_ref.dtype)   # +identity, ReLU


def _fold_conv3x3_weight(w_oihw, W):
    """PyTorch (Cout, Cin, 3, 3) conv weight -> width-folded banded matmul weight of
    shape (3*W*Cin, W*Cout) in bf16.

      row = kh*(W*Cin) + j_in*Cin + ci        col = j_out*Cout + co
      val = w[co, ci, kh, kw]  with  kw = j_in - j_out + 1   if |j_in - j_out| <= 1
            0                                                otherwise
    The band structure implements the zero padding along W, so the kernel needs no
    W-shifts or W-edge masks at all.
    """
    Cout, Cin, KH, KW = w_oihw.shape
    w = jnp.transpose(w_oihw, (2, 3, 1, 0)).astype(jnp.float32)    # (KH, KW, Cin, Cout)
    full = jnp.zeros((KH, W, Cin, W, Cout), jnp.float32)
    for kw in range(KW):
        band = jnp.eye(W, W, k=1 - kw, dtype=jnp.float32)          # j_in = j_out + kw - 1
        full = full + jnp.einsum("hio,ab->haibo", w[:, kw], band)
    return full.reshape(KH * W * Cin, W * Cout).astype(jnp.bfloat16)


def _tile_lane(v, W):
    """(C,) per-channel BN parameter -> (1, W*C) laid out like the activations."""
    return jnp.tile(v.reshape(1, -1).astype(jnp.float32), (1, W))


def block_forward(x_nchw, w1, gamma1, beta1, w2, gamma2, beta2):
    """x_nchw: (B, C, H, W) f32; w*: PyTorch-layout (Cout, Cin, 3, 3).
    stride=1, downsample=None (so Cin == Cout and the identity is the raw input)."""
    B, C, H, W = x_nchw.shape
    Cout = w1.shape[0]
    assert C == Cout, "downsample=None path requires in_channels == out_channels"
    assert W * C <= 1024, "width-folded layout targets the small-channel regime"

    # Lane-dense activation layout: (B*H, W*C); W*C == 128 for the test shape.
    x2d = jnp.transpose(x_nchw, (0, 2, 3, 1)).reshape(B * H, W * C)

    w1f = _fold_conv3x3_weight(w1, W)          # (3*W*C, W*C) bf16
    w2f = _fold_conv3x3_weight(w2, W)
    g1, b1 = _tile_lane(gamma1, W), _tile_lane(beta1, W)
    g2, b2 = _tile_lane(gamma2, W), _tile_lane(beta2, W)

    vmem = pltpu.MemorySpace.VMEM
    out2d = pl.pallas_call(
        functools.partial(_block_kernel, H, W, C),
        out_shape=jax.ShapeDtypeStruct((B * H, W * Cout), x_nchw.dtype),
        in_specs=[pl.BlockSpec(memory_space=vmem)] * 7,
        out_specs=pl.BlockSpec(memory_space=vmem),
        compiler_params=pltpu.CompilerParams(vmem_limit_bytes=64 * 1024 * 1024),
    )(x2d, w1f, g1, b1, w2f, g2, b2)

    return jnp.transpose(out2d.reshape(B, H, W, Cout), (0, 3, 1, 2))


def _reference(x, w1, g1, b1, w2, g2, b2):
    """Pure-JAX reference mirroring the PyTorch forward (training-mode BN)."""
    def conv(x, w):
        return jax.lax.conv_general_dilated(
            x, w, (1, 1), ((1, 1), (1, 1)),
            dimension_numbers=("NCHW", "OIHW", "NCHW"))

    def bn(x, g, b):
        mean = jnp.mean(x, axis=(0, 2, 3), keepdims=True)
        var = jnp.mean((x - mean) ** 2, axis=(0, 2, 3), keepdims=True)
        return ((x - mean) * jax.lax.rsqrt(var + BN_EPS)
                * g.reshape(1, -1, 1, 1) + b.reshape(1, -1, 1, 1))

    out = jnp.maximum(bn(conv(x, w1), g1, b1), 0.0)
    out = bn(conv(out, w2), g2, b2) + x
    return jnp.maximum(out, 0.0)


if __name__ == "__main__":
    B, C, H, W = 2, 8, 16, 16       # in_ch == out_ch == 8, stride=1  (W*C == 128)
    key = jax.random.PRNGKey(0)
    kx, kw1, kw2, kg1, kb1, kg2, kb2 = jax.random.split(key, 7)

    x = jax.random.normal(kx, (B, C, H, W), jnp.float32)
    w1 = jax.random.normal(kw1, (C, C, 3, 3), jnp.float32) * 0.1
    w2 = jax.random.normal(kw2, (C, C, 3, 3), jnp.float32) * 0.1
    gamma1 = 1.0 + 0.1 * jax.random.normal(kg1, (C,), jnp.float32)
    beta1 = 0.1 * jax.random.normal(kb1, (C,), jnp.float32)
    gamma2 = 1.0 + 0.1 * jax.random.normal(kg2, (C,), jnp.float32)
    beta2 = 0.1 * jax.random.normal(kb2, (C,), jnp.float32)

    out = jax.block_until_ready(
        block_forward(x, w1, gamma1, beta1, w2, gamma2, beta2))
    ref = jax.block_until_ready(
        _reference(x, w1, gamma1, beta1, w2, gamma2, beta2))

    assert out.shape == (B, C, H, W)
    # bf16 MXU feeds with f32 accumulation, compared against the pure-f32 reference.
    assert jnp.allclose(out, ref, atol=5e-2, rtol=5e-2)

    print("KERNEL_OK")
</pallas_src>

<mosaic_0001>
module attributes {stable_mosaic.version = 11 : i64} {
  func.func @_block_kernel(%arg0: memref<32x128xf32, #tpu.memory_space<vmem>>, %arg1: memref<384x128xbf16, #tpu.memory_space<vmem>>, %arg2: memref<1x128xf32, #tpu.memory_space<vmem>>, %arg3: memref<1x128xf32, #tpu.memory_space<vmem>>, %arg4: memref<384x128xbf16, #tpu.memory_space<vmem>>, %arg5: memref<1x128xf32, #tpu.memory_space<vmem>>, %arg6: memref<1x128xf32, #tpu.memory_space<vmem>>, %arg7: memref<32x128xf32, #tpu.memory_space<vmem>>) attributes {dimension_semantics = [], scalar_prefetch = 0 : i64, scratch_operands = 0 : i64, tpu.core_type = #tpu.core_type<tc>} {
    %c0 = arith.constant 0 : index
    %c0_0 = arith.constant 0 : index
    %0 = vector.load %arg0[%c0, %c0_0] : memref<32x128xf32, #tpu.memory_space<vmem>>, vector<32x128xf32>
    %1 = tpu.iota {dimensions = array<i32: 0>} : vector<32x1xi32>
    %c16_i32 = arith.constant 16 : i32
    %c0_i32 = arith.constant 0 : i32
    %2 = arith.cmpi eq, %c16_i32, %c0_i32 : i32
    %c1_i32 = arith.constant 1 : i32
    %3 = arith.select %2, %c1_i32, %c16_i32 : i32
    %4 = vector.broadcast %3 : i32 to vector<32x1xi32>
    %5 = arith.remsi %1, %4 : vector<32x1xi32>
    %c0_i32_1 = arith.constant 0 : i32
    %6 = vector.broadcast %c0_i32_1 : i32 to vector<32x1xi32>
    %7 = arith.cmpi ne, %5, %6 : vector<32x1xi32>
    %c0_i32_2 = arith.constant 0 : i32
    %8 = vector.broadcast %c0_i32_2 : i32 to vector<32x1xi32>
    %9 = arith.cmpi slt, %5, %8 : vector<32x1xi32>
    %c0_i32_3 = arith.constant 0 : i32
    %10 = arith.cmpi slt, %3, %c0_i32_3 : i32
    %11 = vector.broadcast %10 : i1 to vector<32x1xi1>
    %12 = vector.broadcast %11 : vector<32x1xi1> to vector<32x1xi1>
    %13 = arith.xori %9, %12 : vector<32x1xi1>
    %14 = arith.andi %13, %7 : vector<32x1xi1>
    %15 = vector.broadcast %3 : i32 to vector<32x1xi32>
    %16 = arith.addi %5, %15 : vector<32x1xi32>
    %17 = arith.select %14, %16, %5 : vector<32x1xi1>, vector<32x1xi32>
    %c1_i32_4 = arith.constant 1 : i32
    %18 = vector.broadcast %c1_i32_4 : i32 to vector<32x1xi32>
    %19 = arith.cmpi sge, %17, %18 : vector<32x1xi32>
    %20 = arith.extui %19 : vector<32x1xi1> to vector<32x1xi32>
    %21 = arith.sitofp %20 : vector<32x1xi32> to vector<32x1xf32>
    %c14_i32 = arith.constant 14 : i32
    %22 = vector.broadcast %c14_i32 : i32 to vector<32x1xi32>
    %23 = arith.cmpi sle, %17, %22 : vector<32x1xi32>
    %24 = arith.extui %23 : vector<32x1xi1> to vector<32x1xi32>
    %25 = arith.sitofp %24 : vector<32x1xi32> to vector<32x1xf32>
    %c1_i32_5 = arith.constant 1 : i32
    %26 = tpu.dynamic_rotate %0 by %c1_i32_5 dim 0 : vector<32x128xf32>, i32 -> vector<32x128xf32>
    %27 = vector.broadcast %21 : vector<32x1xf32> to vector<32x128xf32>
    %28 = arith.mulf %26, %27 : vector<32x128xf32>
    %c31_i32 = arith.constant 31 : i32
    %29 = tpu.dynamic_rotate %0 by %c31_i32 dim 0 : vector<32x128xf32>, i32 -> vector<32x128xf32>
    %30 = vector.broadcast %25 : vector<32x1xf32> to vector<32x128xf32>
    %31 = arith.mulf %29, %30 : vector<32x128xf32>
    %32 = tpu.concatenate %28, %0, %31 in 1 : vector<32x128xf32>, vector<32x128xf32>, vector<32x128xf32> -> vector<32x384xf32>
    %33 = arith.truncf %32 : vector<32x384xf32> to vector<32x384xbf16>
    %c0_6 = arith.constant 0 : index
    %c0_7 = arith.constant 0 : index
    %34 = vector.load %arg1[%c0_6, %c0_7] : memref<384x128xbf16, #tpu.memory_space<vmem>>, vector<384x128xbf16>
    %cst = arith.constant dense<0.000000e+00> : vector<32x128xf32>
    %35 = tpu.matmul %33, %34, %cst {dimension_numbers = #tpu.dot_dimension_numbers<[1], [0], [0], [1], [0, 0, 1, 1], [], []>} : vector<32x384xbf16>, vector<384x128xbf16>, vector<32x128xf32> -> vector<32x128xf32>
    %36 = arith.mulf %35, %35 : vector<32x128xf32>
    %37 = tpu.concatenate %35, %36 in 1 : vector<32x128xf32>, vector<32x128xf32> -> vector<32x256xf32>
    %cst_8 = arith.constant dense<0.000000e+00> : vector<256xf32>
    %38 = vector.multi_reduction <add>, %37, %cst_8 [0] : vector<32x256xf32> to vector<256xf32>
    %39 = vector.shape_cast %38 : vector<256xf32> to vector<1x256xf32>
    %40 = vector.extract_strided_slice %39 {offsets = [0, 0], sizes = [1, 128], strides = [1, 1]} : vector<1x256xf32> to vector<1x128xf32>
    %c8_i32 = arith.constant 8 : i32
    %41 = tpu.dynamic_rotate %40 by %c8_i32 dim 1 : vector<1x128xf32>, i32 -> vector<1x128xf32>
    %42 = arith.addf %40, %41 : vector<1x128xf32>
    %c16_i32_9 = arith.constant 16 : i32
    %43 = tpu.dynamic_rotate %42 by %c16_i32_9 dim 1 : vector<1x128xf32>, i32 -> vector<1x128xf32>
    %44 = arith.addf %42, %43 : vector<1x128xf32>
    %c32_i32 = arith.constant 32 : i32
    %45 = tpu.dynamic_rotate %44 by %c32_i32 dim 1 : vector<1x128xf32>, i32 -> vector<1x128xf32>
    %46 = arith.addf %44, %45 : vector<1x128xf32>
    %c64_i32 = arith.constant 64 : i32
    %47 = tpu.dynamic_rotate %46 by %c64_i32 dim 1 : vector<1x128xf32>, i32 -> vector<1x128xf32>
    %48 = arith.addf %46, %47 : vector<1x128xf32>
    %49 = vector.extract_strided_slice %39 {offsets = [0, 128], sizes = [1, 128], strides = [1, 1]} : vector<1x256xf32> to vector<1x128xf32>
    %c8_i32_10 = arith.constant 8 : i32
    %50 = tpu.dynamic_rotate %49 by %c8_i32_10 dim 1 : vector<1x128xf32>, i32 -> vector<1x128xf32>
    %51 = arith.addf %49, %50 : vector<1x128xf32>
    %c16_i32_11 = arith.constant 16 : i32
    %52 = tpu.dynamic_rotate %51 by %c16_i32_11 dim 1 : vector<1x128xf32>, i32 -> vector<1x128xf32>
    %53 = arith.addf %51, %52 : vector<1x128xf32>
    %c32_i32_12 = arith.constant 32 : i32
    %54 = tpu.dynamic_rotate %53 by %c32_i32_12 dim 1 : vector<1x128xf32>, i32 -> vector<1x128xf32>
    %55 = arith.addf %53, %54 : vector<1x128xf32>
    %c64_i32_13 = arith.constant 64 : i32
    %56 = tpu.dynamic_rotate %55 by %c64_i32_13 dim 1 : vector<1x128xf32>, i32 -> vector<1x128xf32>
    %57 = arith.addf %55, %56 : vector<1x128xf32>
    %cst_14 = arith.constant 0.001953125 : f32
    %58 = vector.broadcast %cst_14 : f32 to vector<1x128xf32>
    %59 = arith.mulf %48, %58 : vector<1x128xf32>
    %cst_15 = arith.constant 0.001953125 : f32
    %60 = vector.broadcast %cst_15 : f32 to vector<1x128xf32>
    %61 = arith.mulf %57, %60 : vector<1x128xf32>
    %62 = arith.mulf %59, %59 : vector<1x128xf32>
    %63 = arith.subf %61, %62 : vector<1x128xf32>
    %cst_16 = arith.constant 9.99999974E-6 : f32
    %64 = vector.broadcast %cst_16 : f32 to vector<1x128xf32>
    %65 = arith.addf %63, %64 : vector<1x128xf32>
    %66 = math.rsqrt %65 : vector<1x128xf32>
    %c0_17 = arith.constant 0 : index
    %c0_18 = arith.constant 0 : index
    %67 = vector.load %arg2[%c0_17, %c0_18] : memref<1x128xf32, #tpu.memory_space<vmem>>, vector<1x128xf32>
    %68 = arith.mulf %66, %67 : vector<1x128xf32>
    %69 = vector.broadcast %68 : vector<1x128xf32> to vector<32x128xf32>
    %70 = arith.mulf %35, %69 : vector<32x128xf32>
    %c0_19 = arith.constant 0 : index
    %c0_20 = arith.constant 0 : index
    %71 = vector.load %arg3[%c0_19, %c0_20] : memref<1x128xf32, #tpu.memory_space<vmem>>, vector<1x128xf32>
    %72 = arith.mulf %59, %68 : vector<1x128xf32>
    %73 = arith.subf %71, %72 : vector<1x128xf32>
    %74 = vector.broadcast %73 : vector<1x128xf32> to vector<32x128xf32>
    %75 = arith.addf %70, %74 : vector<32x128xf32>
    %cst_21 = arith.constant 0.000000e+00 : f32
    %76 = vector.broadcast %cst_21 : f32 to vector<32x128xf32>
    %77 = arith.maximumf %75, %76 : vector<32x128xf32>
    %c1_i32_22 = arith.constant 1 : i32
    %78 = tpu.dynamic_rotate %77 by %c1_i32_22 dim 0 : vector<32x128xf32>, i32 -> vector<32x128xf32>
    %79 = vector.broadcast %21 : vector<32x1xf32> to vector<32x128xf32>
    %80 = arith.mulf %78, %79 : vector<32x128xf32>
    %c31_i32_23 = arith.constant 31 : i32
    %81 = tpu.dynamic_rotate %77 by %c31_i32_23 dim 0 : vector<32x128xf32>, i32 -> vector<32x128xf32>
    %82 = vector.broadcast %25 : vector<32x1xf32> to vector<32x128xf32>
    %83 = arith.mulf %81, %82 : vector<32x128xf32>
    %84 = tpu.concatenate %80, %77, %83 in 1 : vector<32x128xf32>, vector<32x128xf32>, vector<32x128xf32> -> vector<32x384xf32>
    %85 = arith.truncf %84 : vector<32x384xf32> to vector<32x384xbf16>
    %c0_24 = arith.constant 0 : index
    %c0_25 = arith.constant 0 : index
    %86 = vector.load %arg4[%c0_24, %c0_25] : memref<384x128xbf16, #tpu.memory_space<vmem>>, vector<384x128xbf16>
    %cst_26 = arith.constant dense<0.000000e+00> : vector<32x128xf32>
    %87 = tpu.matmul %85, %86, %cst_26 {dimension_numbers = #tpu.dot_dimension_numbers<[1], [0], [0], [1], [0, 0, 1, 1], [], []>} : vector<32x384xbf16>, vector<384x128xbf16>, vector<32x128xf32> -> vector<32x128xf32>
    %88 = arith.mulf %87, %87 : vector<32x128xf32>
    %89 = tpu.concatenate %87, %88 in 1 : vector<32x128xf32>, vector<32x128xf32> -> vector<32x256xf32>
    %cst_27 = arith.constant dense<0.000000e+00> : vector<256xf32>
    %90 = vector.multi_reduction <add>, %89, %cst_27 [0] : vector<32x256xf32> to vector<256xf32>
    %91 = vector.shape_cast %90 : vector<256xf32> to vector<1x256xf32>
    %92 = vector.extract_strided_slice %91 {offsets = [0, 0], sizes = [1, 128], strides = [1, 1]} : vector<1x256xf32> to vector<1x128xf32>
    %c8_i32_28 = arith.constant 8 : i32
    %93 = tpu.dynamic_rotate %92 by %c8_i32_28 dim 1 : vector<1x128xf32>, i32 -> vector<1x128xf32>
    %94 = arith.addf %92, %93 : vector<1x128xf32>
    %c16_i32_29 = arith.constant 16 : i32
    %95 = tpu.dynamic_rotate %94 by %c16_i32_29 dim 1 : vector<1x128xf32>, i32 -> vector<1x128xf32>
    %96 = arith.addf %94, %95 : vector<1x128xf32>
    %c32_i32_30 = arith.constant 32 : i32
    %97 = tpu.dynamic_rotate %96 by %c32_i32_30 dim 1 : vector<1x128xf32>, i32 -> vector<1x128xf32>
    %98 = arith.addf %96, %97 : vector<1x128xf32>
    %c64_i32_31 = arith.constant 64 : i32
    %99 = tpu.dynamic_rotate %98 by %c64_i32_31 dim 1 : vector<1x128xf32>, i32 -> vector<1x128xf32>
    %100 = arith.addf %98, %99 : vector<1x128xf32>
    %101 = vector.extract_strided_slice %91 {offsets = [0, 128], sizes = [1, 128], strides = [1, 1]} : vector<1x256xf32> to vector<1x128xf32>
    %c8_i32_32 = arith.constant 8 : i32
    %102 = tpu.dynamic_rotate %101 by %c8_i32_32 dim 1 : vector<1x128xf32>, i32 -> vector<1x128xf32>
    %103 = arith.addf %101, %102 : vector<1x128xf32>
    %c16_i32_33 = arith.constant 16 : i32
    %104 = tpu.dynamic_rotate %103 by %c16_i32_33 dim 1 : vector<1x128xf32>, i32 -> vector<1x128xf32>
    %105 = arith.addf %103, %104 : vector<1x128xf32>
    %c32_i32_34 = arith.constant 32 : i32
    %106 = tpu.dynamic_rotate %105 by %c32_i32_34 dim 1 : vector<1x128xf32>, i32 -> vector<1x128xf32>
    %107 = arith.addf %105, %106 : vector<1x128xf32>
    %c64_i32_35 = arith.constant 64 : i32
    %108 = tpu.dynamic_rotate %107 by %c64_i32_35 dim 1 : vector<1x128xf32>, i32 -> vector<1x128xf32>
    %109 = arith.addf %107, %108 : vector<1x128xf32>
    %cst_36 = arith.constant 0.001953125 : f32
    %110 = vector.broadcast %cst_36 : f32 to vector<1x128xf32>
    %111 = arith.mulf %100, %110 : vector<1x128xf32>
    %cst_37 = arith.constant 0.001953125 : f32
    %112 = vector.broadcast %cst_37 : f32 to vector<1x128xf32>
    %113 = arith.mulf %109, %112 : vector<1x128xf32>
    %114 = arith.mulf %111, %111 : vector<1x128xf32>
    %115 = arith.subf %113, %114 : vector<1x128xf32>
    %cst_38 = arith.constant 9.99999974E-6 : f32
    %116 = vector.broadcast %cst_38 : f32 to vector<1x128xf32>
    %117 = arith.addf %115, %116 : vector<1x128xf32>
    %118 = math.rsqrt %117 : vector<1x128xf32>
    %c0_39 = arith.constant 0 : index
    %c0_40 = arith.constant 0 : index
    %119 = vector.load %arg5[%c0_39, %c0_40] : memref<1x128xf32, #tpu.memory_space<vmem>>, vector<1x128xf32>
    %120 = arith.mulf %118, %119 : vector<1x128xf32>
    %121 = vector.broadcast %120 : vector<1x128xf32> to vector<32x128xf32>
    %122 = arith.mulf %87, %121 : vector<32x128xf32>
    %c0_41 = arith.constant 0 : index
    %c0_42 = arith.constant 0 : index
    %123 = vector.load %arg6[%c0_41, %c0_42] : memref<1x128xf32, #tpu.memory_space<vmem>>, vector<1x128xf32>
    %124 = arith.mulf %111, %120 : vector<1x128xf32>
    %125 = arith.subf %123, %124 : vector<1x128xf32>
    %126 = vector.broadcast %125 : vector<1x128xf32> to vector<32x128xf32>
    %127 = arith.addf %122, %126 : vector<32x128xf32>
    %128 = arith.addf %127, %0 : vector<32x128xf32>
    %cst_43 = arith.constant 0.000000e+00 : f32
    %129 = vector.broadcast %cst_43 : f32 to vector<32x128xf32>
    %130 = arith.maximumf %128, %129 : vector<32x128xf32>
    %c0_44 = arith.constant 0 : index
    %c0_45 = arith.constant 0 : index
    %131 = vector.load %arg7[%c0_44, %c0_45] : memref<32x128xf32, #tpu.memory_space<vmem>>, vector<32x128xf32>
    tpu.vector_store %arg7[%c0_44, %c0_45], %130 {strides = array<i32>} : memref<32x128xf32, #tpu.memory_space<vmem>>, vector<32x128xf32>,
    return
  }
}

</mosaic_0001>

<bundles_post_ra>
// kernel: tpu_custom_call.1
= control target key start
LH: loop header
LB: loop body
LE: loop exit
PB: predicated region body
PF: predicated region fallthrough
CT: control target
= control target key end

     0   :  { %12 = vsyncpa [#allocation3], 0  ;;  %s1772_s0 = inlined_call_operand.hbm [shape: f32[32,128], index: 0, kind: input, shape index: {}]   ;;  %s1773_s1 = inlined_call_operand.hbm [shape: bf16[384,128], index: 1, kind: input, shape index: {}]   ;;  %s1774_s2 = inlined_call_operand.hbm [shape: f32[1,128], index: 2, kind: input, shape index: {}]   ;;  %s1775_s3 = inlined_call_operand.hbm [shape: f32[1,128], index: 3, kind: input, shape index: {}]   ;;  %s1776_s4 = inlined_call_operand.hbm [shape: bf16[384,128], index: 4, kind: input, shape index: {}]   ;;  %s1777_s5 = inlined_call_operand.hbm [shape: f32[1,128], index: 5, kind: input, shape index: {}]   ;;  %s1778_s6 = inlined_call_operand.hbm [shape: f32[1,128], index: 6, kind: input, shape index: {}]   ;;  %s1779_s7 = inlined_call_operand.hbm [shape: f32[32,128], index: 7, kind: output, shape index: {}]  }
   0x1   :  { %13 = vsyncpa [#allocation6], 0 }
   0x2   :  { %14 = vsyncpa [#allocation9], 0 }
   0x3   :  { %15 = vsyncpa [#allocation12], 0 }
   0x4   :  { %16 = vsyncpa [#allocation4], 0  ;;  %s1445_s24 = smov [#allocation5]   ;;  %s1259_s28 = scalar_lea.hbm %s1773_s1, 3072 }
   0x5   :  { %s34_s25 = sshll.u32 %s1445_s24, 4  ;;  %p1260_p0 = scmp.ne.s32.totalorder %s1773_s1, %s1259_s28  ;;  %s35_s25 = int_to_ptr.vmem [resolvable:$true] %s34_s25 }
   0x6   :  { %p1263_p1 = scmp.lt.u32.totalorder %s1259_s28, %s1773_s1 }
   0x8   :  { %p1265_p2 = pnand %p1263_p1, %p1260_p0 }
   0xa   :  { %1268 = shalt.err (!%p1265_p2)
}
   0xb   :  { %s1269_s10 = scalar_lea.vmem %s35_s25, 3072  ;;  %p1274_p4 = scmp.lt.s32.totalorder %s35_s25, %s35_s25 }
   0xc   :  { %p1270_p3 = scmp.ne.s32.totalorder %s35_s25, %s1269_s10  ;;  %p1275_p5 = scmp.lt.s32.totalorder %s1269_s10, %s1269_s10 }
   0xe   :  { %p1276_p6 = por %p1275_p5, %p1274_p4 }
  0x10   :  { %p1277_p7 = pnand %p1276_p6, %p1270_p3 }
  0x12   :  { %1280 = shalt.err (!%p1277_p7)
}
  0x13   :  { %s1446_s11 = smov 64   ;;  %s1447_s12 = smov 4  }
  0x14   :  { %40 = dma.hbm_to_vmem [thread:$0]  %s1773_s1, 3072, %s35_s25, [#allocation6], %s1446_s11, %s1446_s11, %s1447_s12  }
  0x15   :  { %s1448_s15 = smov [#allocation8]   ;;  %s1449_s17 = smov [#allocation11]  }
  0x16   :  { %s57_s16 = sshll.u32 %s1448_s15, 4  ;;  %s79_s18 = sshll.u32 %s1449_s17, 4  ;;  %s58_s16 = int_to_ptr.vmem [resolvable:$true] %s57_s16  ;;  %s80_s18 = int_to_ptr.vmem [resolvable:$true] %s79_s18 }
  0x17   :  { %s1281_s21 = scalar_lea.hbm %s1775_s3, 16 }
  0x18   :  { %p1282_p8 = scmp.ne.s32.totalorder %s1775_s3, %s1281_s21  ;;  %p1285_p9 = scmp.lt.u32.totalorder %s1281_s21, %s1775_s3 }
  0x1a   :  { %p1287_p10 = pnand %p1285_p9, %p1282_p8 }
  0x1c   :  { %1290 = shalt.err (!%p1287_p10)
}
  0x1d   :  { %s1291_s1 = scalar_lea.vmem %s58_s16, 16  ;;  %s1295_s25 = scalar_lea.vmem %s58_s16, 32 }
  0x1e   :  { %p1292_p11 = scmp.ne.s32.totalorder %s58_s16, %s1291_s1  ;;  %p1296_p12 = scmp.lt.s32.totalorder %s58_s16, %s58_s16 }
  0x1f   :  { %p1297_p13 = scmp.lt.s32.totalorder %s1295_s25, %s1291_s1 }
  0x21   :  { %p1298_p0 = por %p1297_p13, %p1296_p12 }
  0x23   :  { %p1299_p1 = pnand %p1298_p0, %p1292_p11 }
  0x25   :  { %1302 = shalt.err (!%p1299_p1)
}
  0x26   :  { %60 = dma.hbm_to_vmem [thread:$0]  %s1775_s3, 16, %s58_s16, [#allocation9]  }
  0x27   :  { %s1303_s8 = scalar_lea.hbm %s1777_s5, 16 }
  0x28   :  { %p1304_p2 = scmp.ne.s32.totalorder %s1777_s5, %s1303_s8  ;;  %p1307_p3 = scmp.lt.u32.totalorder %s1303_s8, %s1777_s5 }
  0x2a   :  { %p1309_p4 = pnand %p1307_p3, %p1304_p2 }
  0x2c   :  { %1312 = shalt.err (!%p1309_p4)
}
  0x2d   :  { %s1313_s15 = scalar_lea.vmem %s80_s18, 16  ;;  %s1317_s17 = scalar_lea.vmem %s80_s18, 32 }
  0x2e   :  { %p1314_p5 = scmp.ne.s32.totalorder %s80_s18, %s1313_s15  ;;  %p1318_p6 = scmp.lt.s32.totalorder %s80_s18, %s80_s18 }
  0x2f   :  { %p1319_p7 = scmp.lt.s32.totalorder %s1317_s17, %s1313_s15 }
  0x31   :  { %p1320_p8 = por %p1319_p7, %p1318_p6 }
  0x33   :  { %p1321_p9 = pnand %p1320_p8, %p1314_p5 }
  0x35   :  { %1324 = shalt.err (!%p1321_p9)
}
  0x36   :  { %82 = dma.hbm_to_vmem [thread:$0]  %s1777_s5, 16, %s80_s18, [#allocation12]  }
  0x37   :  { %s1450_s19 = smov [#allocation2]   ;;  %s1325_s23 = scalar_lea.hbm %s1772_s0, 512 }
  0x38   :  { %s22_s20 = sshll.u32 %s1450_s19, 4  ;;  %p1326_p10 = scmp.ne.s32.totalorder %s1772_s0, %s1325_s23  ;;  %s23_s20 = int_to_ptr.vmem [resolvable:$true] %s22_s20 }
  0x39   :  { %p1329_p11 = scmp.lt.u32.totalorder %s1325_s23, %s1772_s0 }
  0x3b   :  { %p1331_p12 = pnand %p1329_p11, %p1326_p10 }
  0x3d   :  { %1334 = shalt.err (!%p1331_p12)
}
  0x3e   :  { %s1335_s27 = scalar_lea.vmem %s23_s20, 512  ;;  %p1340_p0 = scmp.lt.s32.totalorder %s23_s20, %s23_s20 }
  0x3f   :  { %p1336_p13 = scmp.ne.s32.totalorder %s23_s20, %s1335_s27  ;;  %p1341_p1 = scmp.lt.s32.totalorder %s1335_s27, %s1335_s27 }
  0x41   :  { %p1342_p2 = por %p1341_p1, %p1340_p0 }
  0x43   :  { %p1343_p3 = pnand %p1342_p2, %p1336_p13 }
  0x45   :  { %1346 = shalt.err (!%p1343_p3)
}
  0x46   :  { %s1451_s5 = smov 128   ;;  %s1452_s18 = smov 8  }
  0x47   :  { %28 = dma.hbm_to_vmem [thread:$0]  %s1772_s0, 512, %s23_s20, [#allocation3], %s1451_s5, %s1451_s5, %s1452_s18  }
  0x48   :  { %s1453_s30 = smov [#allocation7]   ;;  %s1454_s9 = smov [#allocation10]  }
  0x49   :  { %s47_s8 = sshll.u32 %s1453_s30, 4  ;;  %s66_s10 = sshll.u32 %s1454_s9, 4  ;;  %s48_s8 = int_to_ptr.vmem [resolvable:$true] %s47_s8  ;;  %s1554_s10 = int_to_ptr.vmem [resolvable:$true] %s66_s10 }
  0x4a   :  { %s1347_s15 = scalar_lea.hbm %s1774_s2, 16 }
  0x4b   :  { %p1348_p4 = scmp.ne.s32.totalorder %s1774_s2, %s1347_s15  ;;  %p1351_p5 = scmp.lt.u32.totalorder %s1347_s15, %s1774_s2 }
  0x4d   :  { %p1353_p6 = pnand %p1351_p5, %p1348_p4 }
  0x4f   :  { %1356 = shalt.err (!%p1353_p6)
}
  0x50   :  { %s1357_s0 = scalar_lea.vmem %s48_s8, 16  ;;  %s1361_s20 = scalar_lea.vmem %s48_s8, 32 }
  0x51   :  { %p1358_p7 = scmp.ne.s32.totalorder %s48_s8, %s1357_s0  ;;  %p1362_p8 = scmp.lt.s32.totalorder %s48_s8, %s48_s8 }
  0x52   :  { %p1363_p9 = scmp.lt.s32.totalorder %s1361_s20, %s1357_s0 }
  0x54   :  { %p1364_p10 = por %p1363_p9, %p1362_p8 }
  0x56   :  { %p1365_p11 = pnand %p1364_p10, %p1358_p7 }
  0x58   :  { %1368 = shalt.err (!%p1365_p11)
}
  0x59   :  { %50 = dma.hbm_to_vmem [thread:$0]  %s1774_s2, 16, %s48_s8, [#allocation6]  }
  0x5a   :  { %s1369_s26 = scalar_lea.hbm %s1776_s4, 3072 }
  0x5b   :  { %p1370_p12 = scmp.ne.s32.totalorder %s1776_s4, %s1369_s26  ;;  %p1373_p13 = scmp.lt.u32.totalorder %s1369_s26, %s1776_s4 }
  0x5d   :  { %p1375_p0 = pnand %p1373_p13, %p1370_p12 }
  0x5f   :  { %1378 = shalt.err (!%p1375_p0)
}
  0x60   :  { %s1379_s29 = scalar_lea.vmem %s1554_s10, 3072  ;;  %p1384_p2 = scmp.lt.s32.totalorder %s1554_s10, %s1554_s10 }
  0x61   :  { %p1380_p1 = scmp.ne.s32.totalorder %s1554_s10, %s1379_s29  ;;  %p1385_p3 = scmp.lt.s32.totalorder %s1379_s29, %s1379_s29 }
  0x63   :  { %p1386_p4 = por %p1385_p3, %p1384_p2 }
  0x65   :  { %p1387_p5 = pnand %p1386_p4, %p1380_p1 }
  0x67   :  { %1390 = shalt.err (!%p1387_p5)
}
  0x68   :  { %72 = dma.hbm_to_vmem [thread:$0]  %s1776_s4, 3072, %s1554_s10, [#allocation9], %s1446_s11, %s1446_s11, %s1447_s12  }
  0x69   :  { %s1455_s8 = smov [#allocation13]   ;;  %s1391_s15 = scalar_lea.hbm %s1778_s6, 16 }
  0x6a   :  { %s89_s9 = sshll.u32 %s1455_s8, 4  ;;  %p1392_p6 = scmp.ne.s32.totalorder %s1778_s6, %s1391_s15  ;;  %s90_s9 = int_to_ptr.vmem [resolvable:$true] %s89_s9 }
  0x6b   :  { %p1395_p7 = scmp.lt.u32.totalorder %s1391_s15, %s1778_s6 }
  0x6d   :  { %p1397_p8 = pnand %p1395_p7, %p1392_p6 }
  0x6f   :  { %1400 = shalt.err (!%p1397_p8)
}
  0x70   :  { %s1401_s0 = scalar_lea.vmem %s90_s9, 16  ;;  %s1405_s4 = scalar_lea.vmem %s90_s9, 32 }
  0x71   :  { %p1402_p9 = scmp.ne.s32.totalorder %s90_s9, %s1401_s0  ;;  %p1406_p10 = scmp.lt.s32.totalorder %s90_s9, %s90_s9 }
  0x72   :  { %p1407_p11 = scmp.lt.s32.totalorder %s1405_s4, %s1401_s0 }
  0x74   :  { %p1408_p12 = por %p1407_p11, %p1406_p10 }
  0x76   :  { %p1409_p13 = pnand %p1408_p12, %p1402_p9 }
  0x78   :  { %1412 = shalt.err (!%p1409_p13)
}
  0x79   :  { %92 = dma.hbm_to_vmem [thread:$0]  %s1778_s6, 16, %s90_s9, [#allocation12]  }
  0x7a   :  { %1435 = dma.done.wait [#allocation3], 512  }
  0x7b   :  { %1436 = vsyncadd [#allocation3], 4294966784 }
  0x7c   :  { %1437 = dma.done.wait [#allocation6], 3088  }
  0x7d   :  { %1438 = vsyncadd [#allocation6], 4294964208 }
  0x7e   :  { %1439 = dma.done.wait [#allocation9], 3088  }
  0x7f   :  { %1440 = vsyncadd [#allocation9], 4294964208 }
  0x80   :  { %1441 = dma.done.wait [#allocation12], 32  }
  0x81   :  { %1442 = vsyncadd [#allocation12], 4294967264  ;;  %v1207_v0 = vld [vmem:[#allocation5 + $0x40] sm:$0xff]   ;;  %v1210_v3 = vld [vmem:[#allocation5 + $0x48] sm:$0xff]   ;;  %v119_v4 = vlaneseq  ;;  %v1456_v34 = vmov 0.0   ;;  %s1457_s6 = smov 16  }
  0x82   :  { %v1208_v1 = vld [vmem:[#allocation5] sm:$0xff]   ;;  %1076 = vmatprep.subr.bf16.mxu0 %v1207_v0  ;;  %v1211_v5 = vld [vmem:[#allocation5 + $0x8] sm:$0xff]   ;;  %v1213_v7 = vld [vmem:[#allocation5 + $0x50] sm:$0xff]   ;;  %s1458_s20 = smov 32  }
  0x83   :  { %v1209_v2 = vld [vmem:[#allocation5 + $0x80] sm:$0xff]   ;;  %1077 = vmatpush3.bf16.msra.mxu0 %v1208_v1  ;;  %v1212_v6 = vld [vmem:[#allocation5 + $0x88] sm:$0xff]   ;;  %v1214_v8 = vld [vmem:[#allocation5 + $0x10] sm:$0xff]   ;;  %v1600_v9 = vshrl.u32 %v119_v4, 7 }
  0x84   :  { %1152 = vmatprep.subr.bf16.mxu1 %v1209_v2  ;;  %1078 = vmatprep.subr.bf16.mxu0 %v1210_v3  ;;  %v1215_v10 = vld [vmem:[#allocation5 + $0x90] sm:$0xff]   ;;  %v1216_v11 = vld [vmem:[#allocation5 + $0x58] sm:$0xff]   ;;  %v1219_v15 = vld [vmem:[#allocation5 + $0x60] sm:$0xff]  }
  0x85   :  { %1153 = vmatpush3.bf16.msra.mxu1 %v1209_v2  ;;  %v1217_v12 = vld [vmem:[#allocation5 + $0x18] sm:$0xff]   ;;  %v121_v14 = vadd.s32 8, %v1600_v9  ;;  %v123_v16 = vadd.s32 24, %v1600_v9  ;;  %v122_v17 = vadd.s32 16, %v1600_v9  ;;  %v1221_v18 = vld [vmem:[#allocation5 + $0xa0] sm:$0xff]   ;;  %v128_v19 = vand.u32 15, %v1600_v9 }
  0x86   :  { %1154 = vmatprep.subr.bf16.mxu1 %v1212_v6  ;;  %v1218_v13 = vld [vmem:[#allocation5 + $0x98] sm:$0xff]   ;;  %v1220_v20 = vld [vmem:[#allocation5 + $0x20] sm:$0xff]   ;;  %v1222_v22 = vld [vmem:[#allocation5 + $0x68] sm:$0xff]   ;;  %vm200_vm0 = vcmp.lt.s32.totalorder %v1600_v9, 1  ;;  %vm213_vm5 = vcmp.lt.s32.totalorder %v1600_v9, 7 }
  0x87   :  { %1079 = vmatpush3.bf16.msra.mxu0 %v1211_v5  ;;  %v135_v21 = vand.u32 15, %v121_v14  ;;  %v149_v23 = vand.u32 15, %v123_v16  ;;  %v142_v24 = vand.u32 15, %v122_v17  ;;  %v1224_v25 = vld [vmem:[#allocation5 + $0xa8] sm:$0xff]   ;;  %vm1607_vm1 = vcmp.ge.s32.totalorder %v128_v19, 1  ;;  %v1225_v29 = vld [vmem:[#allocation5 + $0x70] sm:$0xff]  }
  0x88   :  { %1080 = vmatprep.subr.bf16.mxu0 %v1213_v7  ;;  %v1223_v27 = vld [vmem:[#allocation5 + $0x28] sm:$0xff]   ;;  %v1226_v31 = vld [vmem:[#allocation5 + $0x30] sm:$0xff]   ;;  %v1228_v33 = vld [vmem:[#allocation5 + $0x78] sm:$0xff]   ;;  %v1622_v35 = vsel %vm1607_vm1, 1.0, %v1456_v34 }
  0x89   :  { %1155 = vmatpush3.bf16.msra.mxu1 %v1212_v6  ;;  %vm1611_vm2 = vcmp.le.s32.totalorder %v135_v21, 14  ;;  %vm1615_vm3 = vcmp.le.s32.totalorder %v149_v23, 14  ;;  %vm174_vm4 = vcmp.ge.s32.totalorder %v142_v24, 1  ;;  %v1227_v32 = vld [vmem:[#allocation5 + $0xb0] sm:$0xff]   ;;  %v1230_v36 = vld [vmem:[#allocation5 + $0xb8] sm:$0xff]   ;;  %v1624_v37 = vld [vmem:[#allocation2] sm:$0xff] }
  0x8a   :  { %1156 = vmatprep.subr.bf16.mxu1 %v1215_v10  ;;  %v1626_v38 = vld [vmem:[#allocation2 + $0x8] sm:$0xff]  ;;  %v1628_v39 = vld [vmem:[#allocation2 + $0x18] sm:$0xff]  ;;  %v1632_v40 = vsel %vm1611_vm2, 1.0, %v1456_v34  ;;  %v1636_v41 = vsel %vm1615_vm3, 1.0, %v1456_v34  ;;  %v1638_v42 = vsel %vm174_vm4, 1.0, %v1456_v34  ;;  %v196_v43 = vrot.slane %v1624_v37, 7 }
  0x8b   :  { %1081 = vmatpush3.bf16.msra.mxu0 %v1214_v8  ;;  %v197_v44 = vrot.slane %v1626_v38, 7  ;;  %v223_v45 = vpack.c.bf16 %v1626_v38, %v1624_v37  ;;  %v199_v46 = vrot.slane %v1628_v39, 7  ;;  %v1645_v47 = vld [vmem:[#allocation2 + $0x10] sm:$0xff]  ;;  %v209_v48 = vrot.slane %v1624_v37, 1  ;;  %v1229_v52 = vld [vmem:[#allocation5 + $0x38] sm:$0xff]  }
  0x8c   :  { %1082 = vmatprep.subr.bf16.mxu0 %v1216_v11  ;;  %v210_v49 = vrot.slane %v1626_v38, 1  ;;  %v211_v50 = vrot.slane %v1645_v47, 1  ;;  %v212_v51 = vrot.slane %v1628_v39, 1  ;;  %v198_v55 = vrot.slane %v1645_v47, 7 }
  0x8d   :  { %1157 = vmatpush3.bf16.msra.mxu1 %v1215_v10  ;;  %452 = vmatprep.mubr.bf16.mxu0 %v223_v45  ;;  %v203_v53 = vsel %vm200_vm0, %v196_v43, %v197_v44  ;;  %v204_v54 = vsel %vm200_vm0, %v199_v46, %v196_v43  ;;  %v226_v1 = vpack.c.bf16 %v1628_v39, %v1645_v47 }
  0x8e   :  { %1158 = vmatprep.subr.bf16.mxu1 %v1218_v13  ;;  %v205_v56 = vmul.f32 %v1622_v35, %v204_v54  ;;  %v215_v57 = vsel %vm213_vm5, %v210_v49, %v211_v50  ;;  %v216_v58 = vsel %vm213_vm5, %v209_v48, %v210_v49  ;;  %v214_v60 = vsel %vm213_vm5, %v211_v50, %v212_v51 }
  0x8f   :  { %1083 = vmatpush3.bf16.msra.mxu0 %v1217_v12  ;;  %v219_v59 = vmul.f32 %v1632_v40, %v215_v57  ;;  %v217_v61 = vsel %vm213_vm5, %v212_v51, %v209_v48  ;;  %v202_v2 = vsel %vm200_vm0, %v197_v44, %v198_v55  ;;  %v201_v5 = vsel %vm200_vm0, %v198_v55, %v199_v46 }
  0x90   :  { %1084 = vmatprep.subr.bf16.mxu0 %v1219_v15  ;;  %v222_v62 = vpack.c.bf16 %v203_v53, %v205_v56  ;;  %v221_v63 = vmul.f32 %v1636_v41, %v217_v61  ;;  %v207_v4 = vmul.f32 %v1638_v42, %v202_v2  ;;  %v1231_v2 = vld [vmem:[#allocation10 + $0x40] sm:$0xff]  }
  0x91   :  { %1159 = vmatpush3.bf16.msra.mxu1 %v1218_v13  ;;  %v224_v0 = vpack.c.bf16 %v219_v59, %v216_v58 }
  0x92   :  { %1160 = vmatprep.subr.bf16.mxu1 %v1221_v18  ;;  %v227_v3 = vpack.c.bf16 %v221_v63, %v214_v60  ;;  %v225_v6 = vpack.c.bf16 %v201_v5, %v207_v4  ;;  %v1233_v4 = vld [vmem:[#allocation10 + $0x80] sm:$0xff]  }
  0x93   :  { %1085 = vmatpush3.bf16.msra.mxu0 %v1220_v20  ;;  %1168 = vmatprep.mubr.bf16.mxu1 %v224_v0 }
  0x94   :  { %1086 = vmatprep.subr.bf16.mxu0 %v1222_v22 }
  0x95   :  { %1161 = vmatpush3.bf16.msra.mxu1 %v1221_v18 }
  0x96   :  { %1162 = vmatprep.subr.bf16.mxu1 %v1224_v25 }
  0x97   :  { %1087 = vmatpush3.bf16.msra.mxu0 %v1223_v27 }
  0x98   :  { %1088 = vmatprep.subr.bf16.mxu0 %v1225_v29 }
  0x99   :  { %1163 = vmatpush3.bf16.msra.mxu1 %v1224_v25 }
  0x9a   :  { %1164 = vmatprep.subr.bf16.mxu1 %v1227_v32 }
  0x9b   :  { %1089 = vmatpush3.bf16.msra.mxu0 %v1226_v31 }
  0x9c   :  { %1090 = vmatprep.subr.bf16.mxu0 %v1228_v33 }
  0x9d   :  { %1165 = vmatpush3.bf16.msra.mxu1 %v1227_v32 }
  0x9e   :  { %1166 = vmatprep.subr.bf16.mxu1 %v1230_v36 }
  0x9f   :  { %1091 = vmatpush3.bf16.msra.mxu0 %v1229_v52 }
  0xa0   :  { %1114 = vmatprep.subr.bf16.mxu0 %v1231_v2 }
  0xa1   :  { %1167 = vmatpush3.bf16.msra.mxu1 %v1230_v36 }
  0xa2   :  { %453 = vmatmul.mubr.bf16.vlgmr.msra.gmra.mrb[0].mxu0 %v222_v62  ;;  %1172 = vmatprep.subr.bf16.mxu1 %v1233_v4 }
  0xa3   :  { %460 = vmatprep.mubr.bf16.mxu0 %v226_v1 }
  0xa4   :  { %1169 = vmatmul.mubr.bf16.vlgmr.msra.gmra.mrb[0].mxu1 %v227_v3  ;;  %v1232_v3 = vld [vmem:[#allocation10] sm:$0xff]  }
  0xa5   :  { %1115 = vmatpush3.bf16.msra.mxu0 %v1232_v3  ;;  %1173 = vmatpush3.bf16.msra.mxu1 %v1233_v4 }
  0xaa   :  { %461 = vmatmul.mubr.bf16.gmra.mrb[4].mxu0 %v225_v6 }
 0x175   :  { %v1092_v7 = vpop.f32.mrb[0].mxu0 }
 0x176   :  { %v1093_v8 = vpop.f32.mrb[1].mxu0 }
 0x177   :  { %v1094_v10 = vadd.f32 %v1093_v8, %v1092_v7  ;;  %v1095_v11 = vpop.f32.mrb[2].mxu0  ;;  %v1170_v12 = vpop.f32.mrb[0].mxu1  ;;  %v1234_v7 = vld [vmem:[#allocation10 + $0x48] sm:$0xff]  }
 0x178   :  { %v1096_v13 = vpop.f32.mrb[3].mxu0  ;;  %v503_v14 = vpop.f32.mrb[1].mxu1  ;;  %v1235_v8 = vld [vmem:[#allocation10 + $0x8] sm:$0xff]   ;;  %1116 = vmatprep.subr.bf16.mxu0 %v1234_v7 }
 0x179   :  { %v1097_v15 = vadd.f32 %v1096_v13, %v1095_v11  ;;  %v1674_v16 = vadd.f32 %v1094_v10, %v503_v14  ;;  %v1171_v17 = vpop.f32.mrb[2].mxu1  ;;  %v1236_v10 = vld [vmem:[#allocation10 + $0x88] sm:$0xff]   ;;  %1117 = vmatpush3.bf16.msra.mxu0 %v1235_v8  ;;  %v1237_v13 = vld [vmem:[#allocation10 + $0x50] sm:$0xff]  }
 0x17a   :  { %v506_v18 = vpop.f32.mrb[3].mxu1  ;;  %1174 = vmatprep.subr.bf16.mxu1 %v1236_v10  ;;  %v1238_v14 = vld [vmem:[#allocation10 + $0x10] sm:$0xff]   ;;  %1118 = vmatprep.subr.bf16.mxu0 %v1237_v13 }
 0x17b   :  { %v1676_v19 = vadd.f32 %v1097_v15, %v506_v18  ;;  %v518_v26 = vmul.f32 %v1674_v16, %v1674_v16  ;;  %1175 = vmatpush3.bf16.msra.mxu1 %v1236_v10  ;;  %v1239_v15 = vld [vmem:[#allocation10 + $0x90] sm:$0xff]   ;;  %v1241_v18 = vld [vmem:[#allocation10 + $0x18] sm:$0xff]  }
 0x17c   :  { %1176 = vmatprep.subr.bf16.mxu1 %v1239_v15 }
 0x17d   :  { %v1098_v20 = vpop.f32.mrb[4].mxu0  ;;  %v519_v22 = vmul.f32 %v1676_v19, %v1676_v19  ;;  %v522_v27 = vadd.f32 %v1676_v19, %v1674_v16  ;;  %1119 = vmatpush3.bf16.msra.mxu0 %v1238_v14 }
 0x17e   :  { %v1099_v21 = vpop.f32.mrb[5].mxu0 }
 0x17f   :  { %v1100_v23 = vadd.f32 %v1099_v21, %v1098_v20  ;;  %v1101_v24 = vpop.f32.mrb[6].mxu0  ;;  %v531_v30 = vadd.f32 %v519_v22, %v518_v26  ;;  %1177 = vmatpush3.bf16.msra.mxu1 %v1239_v15  ;;  %v1242_v20 = vld [vmem:[#allocation10 + $0x98] sm:$0xff]   ;;  %v1243_v21 = vld [vmem:[#allocation10 + $0x60] sm:$0xff]   ;;  %v1248_v26 = vld [vmem:[#allocation10 + $0xa8] sm:$0xff]  }
 0x180   :  { %v1102_v25 = vpop.f32.mrb[7].mxu0  ;;  %1178 = vmatprep.subr.bf16.mxu1 %v1242_v20  ;;  %v1244_v22 = vld [vmem:[#allocation10 + $0x20] sm:$0xff]  }
 0x181   :  { %v1684_v28 = vadd.f32 %v1170_v12, %v1100_v23  ;;  %v1103_v29 = vadd.f32 %v1102_v25, %v1101_v24  ;;  %v1245_v23 = vld [vmem:[#allocation10 + $0xa0] sm:$0xff]   ;;  %v1246_v24 = vld [vmem:[#allocation10 + $0x68] sm:$0xff]  }
 0x182   :  { %v1247_v25 = vld [vmem:[#allocation10 + $0x28] sm:$0xff]  }
 0x183   :  { %v520_v31 = vmul.f32 %v1684_v28, %v1684_v28  ;;  %v523_v32 = vadd.f32 %v522_v27, %v1684_v28  ;;  %v1689_v33 = vadd.f32 %v1171_v17, %v1103_v29  ;;  %v1240_v17 = vld [vmem:[#allocation10 + $0x58] sm:$0xff]   ;;  %1179 = vmatpush3.bf16.msra.mxu1 %v1242_v20  ;;  %v1249_v27 = vld [vmem:[#allocation10 + $0x70] sm:$0xff]  }
 0x184   :  { %1120 = vmatprep.subr.bf16.mxu0 %v1240_v17  ;;  %1180 = vmatprep.subr.bf16.mxu1 %v1245_v23  ;;  %v1251_v29 = vld [vmem:[#allocation10 + $0xb0] sm:$0xff]  }
 0x185   :  { %v532_v34 = vadd.f32 %v531_v30, %v520_v31  ;;  %v521_v36 = vmul.f32 %v1689_v33, %v1689_v33  ;;  %v524_v43 = vadd.f32 %v523_v32, %v1689_v33  ;;  %1121 = vmatpush3.bf16.msra.mxu0 %v1241_v18  ;;  %v1250_v30 = vld [vmem:[#allocation10 + $0x30] sm:$0xff]   ;;  %v1252_v31 = vld [vmem:[#allocation10 + $0x78] sm:$0xff]  }
 0x186   :  { %1122 = vmatprep.subr.bf16.mxu0 %v1243_v21  ;;  %v1253_v32 = vld [vmem:[#allocation10 + $0x38] sm:$0xff]  }
 0x187   :  { %v525_v44 = vrot.slane %v524_v43, 4  ;;  %v533_v45 = vadd.f32 %v532_v34, %v521_v36  ;;  %1181 = vmatpush3.bf16.msra.mxu1 %v1245_v23  ;;  %v1254_v34 = vld [vmem:[#allocation10 + $0xb8] sm:$0xff]  }
 0x188   :  { %1182 = vmatprep.subr.bf16.mxu1 %v1248_v26 }
 0x189   :  { %v526_v46 = vadd.f32 %v525_v44, %v524_v43  ;;  %v534_v48 = vrot.slane %v533_v45, 4  ;;  %1123 = vmatpush3.bf16.msra.mxu0 %v1244_v22 }
 0x18a   :  { %1124 = vmatprep.subr.bf16.mxu0 %v1246_v24 }
 0x18b   :  { %v527_v49 = vrot.slane %v526_v46, 2  ;;  %v535_v50 = vadd.f32 %v534_v48, %v533_v45  ;;  %1183 = vmatpush3.bf16.msra.mxu1 %v1248_v26 }
 0x18c   :  { %1184 = vmatprep.subr.bf16.mxu1 %v1251_v29 }
 0x18d   :  { %v528_v51 = vadd.f32 %v527_v49, %v526_v46  ;;  %v536_v52 = vrot.slane %v535_v50, 2  ;;  %1125 = vmatpush3.bf16.msra.mxu0 %v1247_v25 }
 0x18e   :  { %1126 = vmatprep.subr.bf16.mxu0 %v1249_v27 }
 0x18f   :  { %v529_v53 = vrot.slane %v528_v51, 1  ;;  %v537_v54 = vadd.f32 %v536_v52, %v535_v50  ;;  %1185 = vmatpush3.bf16.msra.mxu1 %v1251_v29  ;;  %v570_v52 = vld [vmem:[#allocation7] sm:$0x1] }
 0x190   :  { %1186 = vmatprep.subr.bf16.mxu1 %v1254_v34 }
 0x191   :  { %v530_v55 = vadd.f32 %v529_v53, %v528_v51  ;;  %v538_v56 = vrot.slane %v537_v54, 1  ;;  %1127 = vmatpush3.bf16.msra.mxu0 %v1250_v30  ;;  %v1703_v53 = vsub.s32 0, %v1600_v9 }
 0x192   :  { %1128 = vmatprep.subr.bf16.mxu0 %v1252_v31 }
 0x193   :  { %540 = vrot.lane.b32.xlu0 %v530_v55, %s1452_s18  ;;  %v539_v57 = vadd.f32 %v538_v56, %v537_v54  ;;  %1187 = vmatpush3.bf16.msra.mxu1 %v1254_v34  ;;  %v580_v56 = vld [vmem:[#allocation8] sm:$0x1] }
 0x195   :  { %1129 = vmatpush3.bf16.msra.mxu0 %v1253_v32 }
 0x197   :  { %552 = vrot.lane.b32.xlu0 %v539_v57, %s1452_s18 }
 0x205   :  { %v541_v58 = vpop.permute.xlu0 %540 }
 0x206   :  { %v542_v59 = vadd.f32 %v541_v58, %v530_v55 }
 0x208   :  { %543 = vrot.lane.b32.xlu1 %v542_v59, %s1457_s6 }
 0x209   :  { %v553_v60 = vpop.permute.xlu0 %552 }
 0x20a   :  { %v554_v61 = vadd.f32 %v553_v60, %v539_v57 }
 0x20c   :  { %555 = vrot.lane.b32.xlu1 %v554_v61, %s1457_s6 }
 0x27a   :  { %v544_v62 = vpop.permute.xlu1 %543 }
 0x27b   :  { %v545_v63 = vadd.f32 %v544_v62, %v542_v59 }
 0x27d   :  { %546 = vrot.lane.b32.xlu0 %v545_v63, %s1458_s20 }
 0x27e   :  { %v556_v0 = vpop.permute.xlu1 %555 }
 0x27f   :  { %v557_v1 = vadd.f32 %v556_v0, %v554_v61 }
 0x281   :  { %558 = vrot.lane.b32.xlu1 %v557_v1, %s1458_s20 }
 0x2ef   :  { %v547_v5 = vpop.permute.xlu0 %546 }
 0x2f0   :  { %v548_v6 = vadd.f32 %v547_v5, %v545_v63 }
 0x2f2   :  { %549 = vrot.lane.b32.xlu0 %v548_v6, %s1446_s11 }
 0x2f3   :  { %v559_v11 = vpop.permute.xlu1 %558 }
 0x2f4   :  { %v560_v12 = vadd.f32 %v559_v11, %v557_v1 }
 0x2f6   :  { %561 = vrot.lane.b32.xlu1 %v560_v12, %s1446_s11 }
 0x364   :  { %v550_v36 = vpop.permute.xlu0 %549 }
 0x365   :  { %v551_v43 = vadd.f32 %v550_v36, %v548_v6 }
 0x367   :  { %v564_v44 = vmul.f32 0.001953125, %v551_v43 }
 0x368   :  { %v562_v45 = vpop.permute.xlu1 %561 }
 0x369   :  { %v563_v46 = vadd.f32 %v562_v45, %v560_v12  ;;  %v566_v48 = vmul.f32 %v564_v44, %v564_v44 }
 0x36b   :  { %v565_v49 = vmul.f32 0.001953125, %v563_v46 }
 0x36d   :  { %v567_v50 = vsub.f32 %v565_v49, %v566_v48 }
 0x36f   :  { %v568_v51 = vadd.f32 1e-05, %v567_v50 }
 0x371   :  { %1255 = vrsqrt.f32 %v568_v51 }
 0x37b   :  { %v1256_v54 = vpop.eup %1255 }
 0x37c   :  { %v571_v55 = vmul.f32 %v1256_v54, %v570_v52 }
 0x37e   :  { %v575_v57 = vrot.slane %v571_v55, %v1703_v53  ;;  %v581_v58 = vmul.f32 %v571_v55, %v564_v44 }
 0x380   :  { %v582_v59 = vsub.f32 %v580_v56, %v581_v58  ;;  %v579_v60 = vmul.f32 %v575_v57, %v1689_v33  ;;  %v576_v61 = vmul.f32 %v575_v57, %v1674_v16  ;;  %v577_v62 = vmul.f32 %v575_v57, %v1676_v19 }
 0x381   :  { %v578_v0 = vmul.f32 %v575_v57, %v1684_v28 }
 0x382   :  { %v587_v63 = vrot.slane %v582_v59, %v1703_v53 }
 0x384   :  { %v589_v1 = vadd.f32 %v587_v63, %v576_v61  ;;  %v590_v2 = vadd.f32 %v587_v63, %v577_v62  ;;  %v592_v3 = vadd.f32 %v587_v63, %v579_v60  ;;  %v591_v4 = vadd.f32 %v587_v63, %v578_v0 }
 0x386   :  { %v593_v5 = vmax.f32 %v589_v1, 0.0  ;;  %v594_v6 = vmax.f32 %v590_v2, 0.0  ;;  %v596_v7 = vmax.f32 %v592_v3, 0.0  ;;  %v595_v8 = vmax.f32 %v591_v4, 0.0 }
 0x388   :  { %v597_v10 = vrot.slane %v593_v5, 7  ;;  %v598_v11 = vrot.slane %v594_v6, 7  ;;  %v622_v12 = vpack.c.bf16 %v594_v6, %v593_v5  ;;  %v600_v33 = vrot.slane %v596_v7, 7 }
 0x389   :  { %v609_v13 = vrot.slane %v593_v5, 1  ;;  %v610_v16 = vrot.slane %v594_v6, 1  ;;  %v611_v14 = vrot.slane %v595_v8, 1  ;;  %v612_v28 = vrot.slane %v596_v7, 1 }
 0x38a   :  { %851 = vmatprep.mubr.bf16.mxu0 %v622_v12  ;;  %v604_v19 = vsel %vm200_vm0, %v600_v33, %v597_v10  ;;  %v599_v15 = vrot.slane %v595_v8, 7  ;;  %v603_v20 = vsel %vm200_vm0, %v597_v10, %v598_v11  ;;  %v625_v27 = vpack.c.bf16 %v596_v7, %v595_v8 }
 0x38b   :  { %v605_v17 = vmul.f32 %v1622_v35, %v604_v19  ;;  %v614_v18 = vsel %vm213_vm5, %v610_v16, %v611_v14  ;;  %v616_v22 = vsel %vm213_vm5, %v612_v28, %v609_v13  ;;  %v615_v24 = vsel %vm213_vm5, %v609_v13, %v610_v16 }
 0x38c   :  { %v618_v21 = vmul.f32 %v1632_v40, %v614_v18  ;;  %v620_v25 = vmul.f32 %v1636_v41, %v616_v22  ;;  %v613_v35 = vsel %vm213_vm5, %v611_v14, %v612_v28  ;;  %v602_v29 = vsel %vm200_vm0, %v598_v11, %v599_v15 }
 0x38d   :  { %v621_v23 = vpack.c.bf16 %v603_v20, %v605_v17  ;;  %v607_v40 = vmul.f32 %v1638_v42, %v602_v29  ;;  %v601_v31 = vsel %vm200_vm0, %v599_v15, %v600_v33 }
 0x38e   :  { %v623_v26 = vpack.c.bf16 %v618_v21, %v615_v24  ;;  %v626_v30 = vpack.c.bf16 %v620_v25, %v613_v35 }
 0x38f   :  { %852 = vmatmul.mubr.bf16.vlgmr.msra.gmra.mrb[8].mxu0 %v621_v23  ;;  %v624_v32 = vpack.c.bf16 %v601_v31, %v607_v40 }
 0x390   :  { %1188 = vmatprep.mubr.bf16.mxu1 %v623_v26  ;;  %859 = vmatprep.mubr.bf16.mxu0 %v625_v27 }
 0x391   :  { %1189 = vmatmul.mubr.bf16.vlgmr.msra.gmra.mrb[4].mxu1 %v626_v30 }
 0x397   :  { %860 = vmatmul.mubr.bf16.gmra.mrb[12].mxu0 %v624_v32 }
 0x462   :  { %v1130_v41 = vpop.f32.mrb[8].mxu0 }
 0x463   :  { %v1131_v34 = vpop.f32.mrb[9].mxu0 }
 0x464   :  { %v1132_v36 = vadd.f32 %v1131_v34, %v1130_v41  ;;  %v1190_v43 = vpop.f32.mrb[4].mxu1  ;;  %v1133_v44 = vpop.f32.mrb[10].mxu0 }
 0x465   :  { %v902_v45 = vpop.f32.mrb[5].mxu1  ;;  %v1134_v46 = vpop.f32.mrb[11].mxu0 }
 0x466   :  { %v1731_v48 = vadd.f32 %v1132_v36, %v902_v45  ;;  %v1135_v49 = vadd.f32 %v1134_v46, %v1133_v44  ;;  %v1191_v50 = vpop.f32.mrb[6].mxu1  ;;  %v969_v44 = vld [vmem:[#allocation11] sm:$0x1] }
 0x467   :  { %v905_v51 = vpop.f32.mrb[7].mxu1 }
 0x468   :  { %v1733_v52 = vadd.f32 %v1135_v49, %v905_v51  ;;  %v917_v58 = vmul.f32 %v1731_v48, %v1731_v48  ;;  %v979_v49 = vld [vmem:[#allocation13] sm:$0x1] }
 0x46a   :  { %v1136_v42 = vpop.f32.mrb[12].mxu0  ;;  %v918_v9 = vmul.f32 %v1733_v52, %v1733_v52  ;;  %v921_v59 = vadd.f32 %v1733_v52, %v1731_v48 }
 0x46b   :  { %v1137_v54 = vpop.f32.mrb[13].mxu0 }
 0x46c   :  { %v1138_v55 = vadd.f32 %v1137_v54, %v1136_v42  ;;  %v1139_v56 = vpop.f32.mrb[14].mxu0  ;;  %v930_v62 = vadd.f32 %v918_v9, %v917_v58 }
 0x46d   :  { %v1140_v57 = vpop.f32.mrb[15].mxu0 }
 0x46e   :  { %v911_v60 = vadd.f32 %v1190_v43, %v1138_v55  ;;  %v1141_v61 = vadd.f32 %v1140_v57, %v1139_v56 }
 0x470   :  { %v919_v63 = vmul.f32 %v911_v60, %v911_v60  ;;  %v922_v0 = vadd.f32 %v921_v59, %v911_v60  ;;  %v914_v1 = vadd.f32 %v1191_v50, %v1141_v61 }
 0x472   :  { %v931_v2 = vadd.f32 %v930_v62, %v919_v63  ;;  %v920_v3 = vmul.f32 %v914_v1, %v914_v1  ;;  %v923_v4 = vadd.f32 %v922_v0, %v914_v1 }
 0x474   :  { %v924_v5 = vrot.slane %v923_v4, 4  ;;  %v932_v6 = vadd.f32 %v931_v2, %v920_v3 }
 0x476   :  { %v925_v7 = vadd.f32 %v924_v5, %v923_v4  ;;  %v933_v8 = vrot.slane %v932_v6, 4 }
 0x478   :  { %v926_v10 = vrot.slane %v925_v7, 2  ;;  %v934_v11 = vadd.f32 %v933_v8, %v932_v6 }
 0x47a   :  { %v927_v12 = vadd.f32 %v926_v10, %v925_v7  ;;  %v935_v33 = vrot.slane %v934_v11, 2 }
 0x47c   :  { %v928_v13 = vrot.slane %v927_v12, 1  ;;  %v936_v16 = vadd.f32 %v935_v33, %v934_v11 }
 0x47e   :  { %v929_v14 = vadd.f32 %v928_v13, %v927_v12  ;;  %v937_v19 = vrot.slane %v936_v16, 1 }
 0x480   :  { %939 = vrot.lane.b32.xlu0 %v929_v14, %s1452_s18  ;;  %v938_v28 = vadd.f32 %v937_v19, %v936_v16 }
 0x482   :  { %951 = vrot.lane.b32.xlu1 %v938_v28, %s1452_s18 }
 0x4f2   :  { %v940_v15 = vpop.permute.xlu0 %939 }
 0x4f3   :  { %v941_v17 = vadd.f32 %v940_v15, %v929_v14 }
 0x4f4   :  { %v952_v18 = vpop.permute.xlu1 %951 }
 0x4f5   :  { %v953_v20 = vadd.f32 %v952_v18, %v938_v28  ;;  %942 = vrot.lane.b32.xlu0 %v941_v17, %s1457_s6 }
 0x4f7   :  { %954 = vrot.lane.b32.xlu1 %v953_v20, %s1457_s6 }
 0x567   :  { %v943_v21 = vpop.permute.xlu0 %942 }
 0x568   :  { %v944_v22 = vadd.f32 %v943_v21, %v941_v17 }
 0x569   :  { %v955_v23 = vpop.permute.xlu1 %954 }
 0x56a   :  { %v956_v24 = vadd.f32 %v955_v23, %v953_v20  ;;  %945 = vrot.lane.b32.xlu0 %v944_v22, %s1458_s20 }
 0x56c   :  { %957 = vrot.lane.b32.xlu1 %v956_v24, %s1458_s20 }
 0x5dc   :  { %v946_v25 = vpop.permute.xlu0 %945 }
 0x5dd   :  { %v947_v26 = vadd.f32 %v946_v25, %v944_v22 }
 0x5de   :  { %v958_v27 = vpop.permute.xlu1 %957 }
 0x5df   :  { %v959_v35 = vadd.f32 %v958_v27, %v956_v24  ;;  %948 = vrot.lane.b32.xlu0 %v947_v26, %s1446_s11 }
 0x5e1   :  { %960 = vrot.lane.b32.xlu1 %v959_v35, %s1446_s11  ;;  %s1459_s11 = smov [#allocation14]  }
 0x5e2   :  { %s1009_s21 = sshll.u32 %s1459_s11, 4  ;;  %s1010_s21 = int_to_ptr.vmem [resolvable:$true] %s1009_s21 }
 0x5e3   :  { %s1413_s22 = scalar_lea.vmem %s1010_s21, 512  ;;  %p1418_p1 = scmp.lt.s32.totalorder %s1010_s21, %s1010_s21 }
 0x5e4   :  { %p1414_p0 = scmp.ne.s32.totalorder %s1010_s21, %s1413_s22  ;;  %p1419_p2 = scmp.lt.s32.totalorder %s1413_s22, %s1413_s22 }
 0x5e6   :  { %p1420_p3 = por %p1419_p2, %p1418_p1 }
 0x5e8   :  { %p1421_p4 = pnand %p1420_p3, %p1414_p0 }
 0x651   :  { %v949_v29 = vpop.permute.xlu0 %948 }
 0x652   :  { %v950_v30 = vadd.f32 %v949_v29, %v947_v26 }
 0x653   :  { %v961_v40 = vpop.permute.xlu1 %960 }
 0x654   :  { %v963_v31 = vmul.f32 0.001953125, %v950_v30  ;;  %v962_v32 = vadd.f32 %v961_v40, %v959_v35 }
 0x656   :  { %v965_v41 = vmul.f32 %v963_v31, %v963_v31  ;;  %v964_v34 = vmul.f32 0.001953125, %v962_v32 }
 0x658   :  { %v966_v36 = vsub.f32 %v964_v34, %v965_v41 }
 0x65a   :  { %v967_v43 = vadd.f32 1e-05, %v966_v36 }
 0x65c   :  { %1257 = vrsqrt.f32 %v967_v43 }
 0x666   :  { %v1258_v45 = vpop.eup %1257 }
 0x667   :  { %v970_v46 = vmul.f32 %v1258_v45, %v969_v44 }
 0x669   :  { %v974_v50 = vrot.slane %v970_v46, %v1703_v53  ;;  %v980_v51 = vmul.f32 %v970_v46, %v963_v31 }
 0x66b   :  { %v981_v42 = vsub.f32 %v979_v49, %v980_v51  ;;  %v975_v54 = vmul.f32 %v974_v50, %v1731_v48  ;;  %v976_v9 = vmul.f32 %v974_v50, %v1733_v52  ;;  %v977_v55 = vmul.f32 %v974_v50, %v911_v60 }
 0x66c   :  { %v978_v56 = vmul.f32 %v974_v50, %v914_v1 }
 0x66d   :  { %v986_v57 = vrot.slane %v981_v42, %v1703_v53 }
 0x66f   :  { %v988_v58 = vadd.f32 %v986_v57, %v975_v54  ;;  %v989_v59 = vadd.f32 %v986_v57, %v976_v9  ;;  %v990_v61 = vadd.f32 %v986_v57, %v977_v55  ;;  %v991_v62 = vadd.f32 %v986_v57, %v978_v56 }
 0x671   :  { %v992_v63 = vadd.f32 %v988_v58, %v1624_v37  ;;  %v993_v0 = vadd.f32 %v989_v59, %v1626_v38  ;;  %v994_v2 = vadd.f32 %v990_v61, %v1645_v47  ;;  %v995_v48 = vadd.f32 %v991_v62, %v1628_v39 }
 0x673   :  { %v996_v3 = vmax.f32 %v992_v63, 0.0  ;;  %v997_v52 = vmax.f32 %v993_v0, 0.0  ;;  %v998_v60 = vmax.f32 %v994_v2, 0.0  ;;  %v999_v1 = vmax.f32 %v995_v48, 0.0 }
 0x675   :  { %1000 = vst [vmem:[#allocation14] sm:$0xff] %v996_v3  ;;  %1001 = vst [vmem:[#allocation14 + $0x8] sm:$0xff] %v997_v52 }
 0x676   :  { %1002 = vst [vmem:[#allocation14 + $0x10] sm:$0xff] %v998_v60  ;;  %1003 = vst [vmem:[#allocation14 + $0x18] sm:$0xff] %v999_v1 }
 0x677   :  { %1424 = shalt.err (!%p1421_p4)
}
 0x678   :  { %s1425_s26 = scalar_lea.hbm %s1779_s7, 512 }
 0x679   :  { %p1426_p5 = scmp.ne.s32.totalorder %s1779_s7, %s1425_s26  ;;  %p1429_p6 = scmp.lt.u32.totalorder %s1425_s26, %s1779_s7 }
 0x67b   :  { %p1431_p7 = pnand %p1429_p6, %p1426_p5 }
 0x67d   :  { %1434 = shalt.err (!%p1431_p7)
}
 0x67e   :  { %1015 = dma.vmem_to_hbm [thread:$0]  %s1010_s21, 512, %s1779_s7, [#allocation4], %s1451_s5, %s1451_s5, %s1452_s18  }
 0x67f   :  { %1443 = dma.done.wait [#allocation4], 512  }
 0x680   :  { %1444 = vsyncadd [#allocation4], 4294966784 }
 0x681   :  { %1019 = vsyncpa [#allocation3], 1 }
 0x682   :  { %1020 = vsyncpa [#allocation6], 1 }
 0x683   :  { %1021 = vsyncpa [#allocation9], 1 }
 0x684   :  { %1022 = vsyncpa [#allocation12], 1 }
 0x685   :  { %1023 = vsyncpa [#allocation4], 1 }

</bundles_post_ra>
